<compile_context>
chip_gen: v7x
topology: tpu7x:2x2x1
jax: 0.10.0
libtpu: 0.0.40
codegen_flags: <defaults>
</compile_context>

<pallas_src>
import functools

import numpy as np
import jax
import jax.numpy as jnp
from jax.experimental import pallas as pl
from jax.experimental.pallas import tpu as pltpu


# ----------------------------------------------------------------------------
# Host-side construction of the bicubic interpolation matrix (PyTorch-exact).
# ----------------------------------------------------------------------------
def _cubic_coeffs(t, A=-0.75):
    # Matches ATen get_cubic_upsample_coefficients (A = -0.75).
    def conv1(x):  # |x| <= 1
        return ((A + 2.0) * x - (A + 3.0)) * x * x + 1.0

    def conv2(x):  # 1 < |x| < 2
        return ((A * x - 5.0 * A) * x + 8.0 * A) * x - 4.0 * A

    return (conv2(t + 1.0), conv1(t), conv1(1.0 - t), conv2(2.0 - t))


@functools.lru_cache(maxsize=None)
def bicubic_weight_matrix(out_size, in_size):
    """(out_size, in_size) matrix W s.t. W @ v == 1-D bicubic upsample of v
    with align_corners=False (nn.Upsample default). float64, cached."""
    Wmat = np.zeros((out_size, in_size), dtype=np.float64)
    scale = in_size / out_size
    for i in range(out_size):
        src = (i + 0.5) * scale - 0.5          # area_pixel source index (no clamp for cubic)
        i0 = int(np.floor(src))
        t = src - i0
        coeffs = _cubic_coeffs(t)
        for k in range(4):
            idx = min(max(i0 - 1 + k, 0), in_size - 1)   # clamped taps
            Wmat[i, idx] += coeffs[k]
    return Wmat


@functools.lru_cache(maxsize=None)
def _kron_upsample_matrix(out_size, in_size):
    """(out_size*out_size, in_size*in_size) f32 matrix K s.t.
    K @ vec_rowmajor(alpha) == vec_rowmajor(bicubic 2-D upsample of alpha)."""
    Wmat = bicubic_weight_matrix(out_size, in_size)
    return np.ascontiguousarray(np.kron(Wmat, Wmat)).astype(np.float32)


# ----------------------------------------------------------------------------
# Pallas kernel: broadcast multiply of a resident lamb row over (n, c) tiles.
# ----------------------------------------------------------------------------
def info_layer_kernel(lamb_ref, x_ref, o_ref):
    # lamb_ref: (1, HW) or (1, H, W)        -- constant across the grid
    # x_ref:    (nc_tile, HW) / (nc_tile, H, W)
    # Sublane-broadcast multiply; lamb stays a single row, broadcast in-register.
    o_ref[...] = (x_ref[...] * lamb_ref[...]).astype(o_ref.dtype)


def _round_up(v, m):
    return ((v + m - 1) // m) * m


@functools.partial(jax.jit, static_argnames=("input_size", "target_tile_bytes"))
def info_layer_forward(x, alpha, input_size, *, target_tile_bytes=4 << 20):
    """x: (N, C, input_size, input_size) f32;  alpha: (m, m) f32."""
    N, C, H, W = x.shape
    assert H == input_size and W == input_size
    m = alpha.shape[0]
    HW = H * W
    NC = N * C
    itemsize = x.dtype.itemsize

    # ---- lamb precomputed in the wrapper (tiny contraction; XLA handles it) --
    K = jnp.asarray(_kron_upsample_matrix(input_size, m))          # (HW, m*m) const
    up_flat = jnp.dot(K, alpha.reshape(m * m))                     # (HW,)
    lamb_flat = jax.nn.sigmoid(up_flat)                            # (HW,)

    # ---- tiling: ~target_tile_bytes per step, >=2 steps when NC is large ----
    row_bytes = HW * itemsize
    rows_cap = max(8, (target_tile_bytes // row_bytes) // 8 * 8)
    two_step = _round_up(pl.cdiv(NC, 2), 8)     # so >=2 parallel steps (v7x 2 TCs)
    nc_tile = min(rows_cap, two_step)
    if nc_tile >= NC:
        nc_tile = NC                            # single full-dim block (toy sizes)
    grid = (pl.cdiv(NC, nc_tile),)

    # Explicit VMEM budget: 2 buffers x (in tile + out tile) + lamb + headroom.
    # Stays well under v7x's 64 MiB physical VMEM at the default 4 MiB tiles.
    tile_bytes = nc_tile * HW * itemsize
    vmem_limit = min(max(4 * tile_bytes + (4 << 20), 16 << 20), 48 << 20)

    cost = pl.CostEstimate(
        flops=NC * HW,
        transcendentals=0,
        bytes_accessed=(2 * NC * HW + grid[0] * HW) * itemsize,
    )
    cparams = pltpu.CompilerParams(
        dimension_semantics=("parallel",),
        vmem_limit_bytes=int(vmem_limit),
    )

    if HW % 128 == 0:
        # Lane-dense path: output last dim is a multiple of 128 -> unmasked vst.
        x_flat = x.reshape(NC, HW)
        lamb = lamb_flat.reshape(1, HW)
        out_flat = pl.pallas_call(
            info_layer_kernel,
            out_shape=jax.ShapeDtypeStruct((NC, HW), x.dtype),
            grid=grid,
            in_specs=[
                pl.BlockSpec((1, HW), lambda i: (0, 0)),        # lamb, resident
                pl.BlockSpec((nc_tile, HW), lambda i: (i, 0)),  # (n,c)-row tile
            ],
            out_specs=pl.BlockSpec((nc_tile, HW), lambda i: (i, 0)),
            compiler_params=cparams,
            cost_estimate=cost,
        )(lamb, x_flat)
        return out_flat.reshape(N, C, H, W)

    # Fallback for general H, W (full spatial blocks; last two dims equal the
    # array dims, so the (8,128) constraint is satisfied; stores may be masked
    # if W % 128 != 0 — inherent to the layout).
    # TODO(synk): pad W to a multiple of 128 for lane-dense stores at odd sizes.
    x3 = x.reshape(NC, H, W)
    lamb = lamb_flat.reshape(1, H, W)
    out3 = pl.pallas_call(
        info_layer_kernel,
        out_shape=jax.ShapeDtypeStruct((NC, H, W), x.dtype),
        grid=grid,
        in_specs=[
            pl.BlockSpec((1, H, W), lambda i: (0, 0, 0)),
            pl.BlockSpec((nc_tile, H, W), lambda i: (i, 0, 0)),
        ],
        out_specs=pl.BlockSpec((nc_tile, H, W), lambda i: (i, 0, 0)),
        compiler_params=cparams,
        cost_estimate=cost,
    )(lamb, x3)
    return out3.reshape(N, C, H, W)


if __name__ == "__main__":
    # Module hyperparameters (small, consistent with the forward pass).
    input_size = 16
    mask_size = 4
    mask_range = 1.0

    # Deterministic inputs: alpha ~ U(-mask_range, mask_range), x ~ N(0, 1).
    key = jax.random.PRNGKey(0)
    k_alpha, k_x = jax.random.split(key)
    alpha = jax.random.uniform(
        k_alpha, (mask_size, mask_size), dtype=jnp.float32,
        minval=-mask_range, maxval=mask_range)
    x = jax.random.normal(k_x, (2, 4, input_size, input_size), dtype=jnp.float32)

    out = info_layer_forward(x, alpha, input_size)
    jax.block_until_ready(out)

    # Sanity check vs a pure-numpy f64 reference using the same bicubic matrix.
    wmat = bicubic_weight_matrix(input_size, mask_size)
    up = wmat @ np.asarray(alpha, dtype=np.float64) @ wmat.T
    lamb_ref = 1.0 / (1.0 + np.exp(-up))
    ref = np.asarray(x, dtype=np.float64) * lamb_ref[None, None]
    np.testing.assert_allclose(np.asarray(out, dtype=np.float64), ref,
                               rtol=1e-5, atol=1e-5)

    assert out.shape == x.shape and out.dtype == x.dtype
    print("KERNEL_OK")
</pallas_src>

<mosaic_0001>
module attributes {stable_mosaic.version = 11 : i64} {
  func.func @info_layer_kernel(%arg0: i32, %arg1: memref<1x256xf32, #tpu.memory_space<vmem>>, %arg2: memref<8x256xf32, #tpu.memory_space<vmem>>, %arg3: memref<8x256xf32, #tpu.memory_space<vmem>>) attributes {dimension_semantics = [#tpu.dimension_semantics<parallel>], iteration_bounds = array<i64: 1>, scalar_prefetch = 0 : i64, scratch_operands = 0 : i64, tpu.core_type = #tpu.core_type<tc>, window_params = [{pipeline_mode = #tpu.pipeline_mode<synchronous>, transform_indices = @transform_0, window_bounds = array<i64: 1, 256>}, {transform_indices = @transform_1, window_bounds = array<i64: 8, 256>}, {transform_indices = @transform_2, window_bounds = array<i64: 8, 256>}]} {
    %c0 = arith.constant 0 : index
    %c0_0 = arith.constant 0 : index
    %0 = vector.load %arg2[%c0, %c0_0] : memref<8x256xf32, #tpu.memory_space<vmem>>, vector<8x256xf32>
    %c0_1 = arith.constant 0 : index
    %c0_2 = arith.constant 0 : index
    %1 = vector.load %arg1[%c0_1, %c0_2] : memref<1x256xf32, #tpu.memory_space<vmem>>, vector<1x256xf32>
    %2 = vector.broadcast %1 : vector<1x256xf32> to vector<8x256xf32>
    %3 = arith.mulf %0, %2 : vector<8x256xf32>
    %c0_3 = arith.constant 0 : index
    %c0_4 = arith.constant 0 : index
    %4 = vector.load %arg3[%c0_3, %c0_4] : memref<8x256xf32, #tpu.memory_space<vmem>>, vector<8x256xf32>
    tpu.vector_store %arg3[%c0_3, %c0_4], %3 {strides = array<i32>} : memref<8x256xf32, #tpu.memory_space<vmem>>, vector<8x256xf32>,
    return
  }
  func.func @transform_0(%arg0: i32) -> (i32, i32) {
    %c0_i32 = arith.constant 0 : i32
    %c0_i32_0 = arith.constant 0 : i32
    %c0_i32_1 = arith.constant 0 : i32
    return %c0_i32, %c0_i32_0 : i32, i32
  }
  func.func @transform_1(%arg0: i32) -> (i32, i32) {
    %c0_i32 = arith.constant 0 : i32
    %c0_i32_0 = arith.constant 0 : i32
    return %arg0, %c0_i32 : i32, i32
  }
  func.func @transform_2(%arg0: i32) -> (i32, i32) {
    %c0_i32 = arith.constant 0 : i32
    %c0_i32_0 = arith.constant 0 : i32
    return %arg0, %c0_i32 : i32, i32
  }
}

</mosaic_0001>

<bundles_post_ra>
// kernel: info_layer_forward.1
= control target key start
LH: loop header
LB: loop body
LE: loop exit
PB: predicated region body
PF: predicated region fallthrough
CT: control target
= control target key end

     0   :  { %v15_v0 = vlaneseq  ;;  %s63_s0 = inlined_call_operand.vmem [shape: f32[1,256], index: 0, kind: input, shape index: {}]   ;;  %s64_s1 = inlined_call_operand.vmem [shape: f32[8,256], index: 1, kind: input, shape index: {}]   ;;  %s65_s2 = inlined_call_operand.vmem [shape: f32[8,256], index: 2, kind: output, shape index: {}]  }
   0x1   :  { %v13_v2 = vld [vmem:[%s63_s0] sm:$0x3]  ;;  %v12_v6 = vld [vmem:[%s64_s1 + $0x8] sm:$0xff] }
   0x2   :  { %v16_v1 = vshrl.u32 %v15_v0, 7  ;;  %v11_v5 = vld [vmem:[%s64_s1] sm:$0xff] }
   0x4   :  { %v17_v3 = vsub.s32 0, %v16_v1  ;;  %v21_v4 = vsub.s32 1, %v16_v1 }
   0x6   :  { %v18_v7 = vrot.slane %v13_v2, %v17_v3  ;;  %v22_v8 = vrot.slane %v13_v2, %v21_v4 }
   0x8   :  { %v25_v9 = vmul.f32 %v18_v7, %v11_v5  ;;  %v26_v10 = vmul.f32 %v22_v8, %v12_v6 }
   0xa   :  { %27 = vst [vmem:[%s65_s2] sm:$0xff] %v25_v9  ;;  %28 = vst [vmem:[%s65_s2 + $0x8] sm:$0xff] %v26_v10 }

</bundles_post_ra>
